<compile_context>
chip_gen: v7x
topology: tpu7x:2x2x1
jax: 0.10.0
libtpu: 0.0.40
codegen_flags: <defaults>
</compile_context>

<pallas_src>
import functools

import jax
import jax.numpy as jnp
from jax.experimental import pallas as pl
from jax.experimental.pallas import tpu as pltpu

EPS = 1e-5


# -------------------------------------------------------------------- probe ---

@functools.cache
def _roll_matches_numpy() -> bool:
    """One-time probe: does pltpu.roll use jnp.roll/np.roll shift direction?

    The depthwise taps depend on the shift direction; this tiny kernel pins the
    convention down so the main kernels are robust either way.
    """
    def kernel(x_ref, o_ref):
        o_ref[...] = pltpu.roll(x_ref[...], shift=1, axis=1)

    x = jnp.broadcast_to(jnp.arange(128, dtype=jnp.float32)[None, :], (8, 128))
    out = pl.pallas_call(
        kernel, out_shape=jax.ShapeDtypeStruct((8, 128), jnp.float32))(x)
    return bool(out[0, 0] == 127.0)   # np.roll semantics: out[i] = in[i - shift]


# ------------------------------------------------------------------ kernels ---

def _pointwise_stats_kernel(x_ref, w_ref, h_ref, hsum_ref, hsq_ref):
    """1x1 conv (channels-first, lane-dense) + per-channel sum / sumsq partials.

    x_ref: (1, C_in, S)   w_ref: (C_out, C_in) == w1.T
    h_ref: (1, C_out, S)  hsum_ref / hsq_ref: (1, C_out, 1)
    """
    x = x_ref[0]                      # [C_in, S]
    w = w_ref[...]                    # [C_out, C_in]  (hoisted, loaded once)
    c_in = w.shape[1]
    if c_in <= 16:
        # Tiny contraction: C_in broadcast-FMAs on the VPU; avoids MXU warm-up/drain
        # and keeps exact f32 accumulation.
        h = w[:, 0:1] * x[0:1, :]
        for ci in range(1, c_in):
            h = h + w[:, ci:ci + 1] * x[ci:ci + 1, :]
    else:
        # [C_out, C_in] x [C_in, S]: the long dim S fills the MXU N axis / lanes.
        h = jnp.dot(w, x, preferred_element_type=jnp.float32)
    h_ref[0] = h
    hsum_ref[0] = jnp.sum(h, axis=1, keepdims=True)
    hsq_ref[0] = jnp.sum(h * h, axis=1, keepdims=True)


def _depthwise_stats_kernel(h_ref, sc_ref, sh_ref, w_ref, m_ref,
                            z_ref, zsum_ref, zsq_ref, *, D, H, W, roll_fwd):
    """Fused BN1(scale/shift)+ReLU -> channelwise 3x3x3 conv -> BN2 partial sums.

    h_ref: (1, C, S) raw 1x1-conv output      sc_ref/sh_ref: (C, 1) BN1 affine
    w_ref: (C, 27) per-channel taps           m_ref: (27, S) {0,1} boundary masks
    z_ref: (1, C, S) conv output              zsum_ref/zsq_ref: (1, C, 1)
    """
    S = D * H * W
    y = jnp.maximum(h_ref[0] * sc_ref[...] + sh_ref[...], 0.0)   # [C, S]
    w_all = w_ref[...]                                           # [C, 27], loaded once

    acc = jnp.zeros_like(y)
    k = 0
    for dz in (-1, 0, 1):
        for dy in (-1, 0, 1):
            for dx in (-1, 0, 1):
                off = dz * H * W + dy * W + dx
                if off == 0:
                    tap = y
                else:
                    # tap[s] = y[s + off]: lane rotate on the XLU; lanes that wrapped
                    # across a D/H/W boundary are zeroed by the precomputed mask.
                    shift = (-off) % S if roll_fwd else off % S
                    tap = pltpu.roll(y, shift=shift, axis=1)
                    tap = tap * m_ref[k:k + 1, :]
                acc = acc + tap * w_all[:, k:k + 1]
                k += 1

    z_ref[0] = acc
    zsum_ref[0] = jnp.sum(acc, axis=1, keepdims=True)
    zsq_ref[0] = jnp.sum(acc * acc, axis=1, keepdims=True)


def _bn_residual_kernel(z_ref, x_ref, sc_ref, sh_ref, o_ref):
    """BN2(scale/shift) + ReLU + residual add + ReLU on lane-dense [C, S] slabs."""
    zn = jnp.maximum(z_ref[0] * sc_ref[...] + sh_ref[...], 0.0)
    o_ref[0] = jnp.maximum(zn + x_ref[0], 0.0)


# ----------------------------------------------------------------- wrappers ---

def _tap_masks(D, H, W):
    """[27, S] {0,1}: row k is 1 where the k-th 3x3x3 tap of the flat voxel index
    stays inside the (D, H, W) grid (a missing neighbor contributes zero)."""
    s = jnp.arange(D * H * W, dtype=jnp.int32)
    d, h, w = s // (H * W), (s // W) % H, s % W
    rows = []
    for dz in (-1, 0, 1):
        for dy in (-1, 0, 1):
            for dx in (-1, 0, 1):
                rows.append((d + dz >= 0) & (d + dz < D)
                            & (h + dy >= 0) & (h + dy < H)
                            & (w + dx >= 0) & (w + dx < W))
    return jnp.stack(rows).astype(jnp.float32)


def _bn_affine(psum, psqsum, count, gamma, beta):
    """Global-batch mean/var from per-block partial sums, folded with gamma/beta into
    a per-channel (scale, shift). Tiny [C]-sized work done once per BatchNorm."""
    total = jnp.sum(psum, axis=0)                  # [C, 1]
    total_sq = jnp.sum(psqsum, axis=0)             # [C, 1]
    mean = total / count
    var = jnp.maximum(total_sq / count - mean * mean, 0.0)
    rstd = jax.lax.rsqrt(var + EPS)
    scale = gamma.reshape(-1, 1) * rstd
    shift = beta.reshape(-1, 1) - mean * scale
    return scale, shift


def init_params(key, planes):
    k1, k2, k3, k4, k5, k6 = jax.random.split(key, 6)
    w1 = jax.random.normal(k1, (planes, planes), jnp.float32) * (1.0 / planes ** 0.5)
    g1 = 1.0 + 0.1 * jax.random.normal(k2, (1, planes), jnp.float32)
    b1 = 0.1 * jax.random.normal(k3, (1, planes), jnp.float32)
    wdw = jax.random.normal(k4, (27, planes), jnp.float32) * (1.0 / 27.0 ** 0.5)
    g2 = 1.0 + 0.1 * jax.random.normal(k5, (1, planes), jnp.float32)
    b2 = 0.1 * jax.random.normal(k6, (1, planes), jnp.float32)
    return dict(w1=w1, g1=g1, b1=b1, wdw=wdw, g2=g2, b2=b2)


def single_channel_conv_forward(x, params):
    """Forward pass of SingleChannelConv. x: [B, C, D, H, W] float32 (NCDHW)."""
    B, C, D, H, W = x.shape
    S = D * H * W
    count = B * S
    roll_fwd = _roll_matches_numpy()

    # NCDHW is already channels-first: flattening D,H,W into one lane-dense axis is a
    # free reshape (no transpose, no extra HBM round trip).
    x3 = x.reshape(B, C, S).astype(jnp.float32)

    w1t = params["w1"].T            # [C_out, C_in]
    wdwt = params["wdw"].T          # [C, 27]
    masks = _tap_masks(D, H, W)     # [27, S]

    grid = (B,)
    blk_act = pl.BlockSpec((1, C, S), lambda b: (b, 0, 0))     # one sample slab
    blk_vec = pl.BlockSpec((C, 1), lambda b: (0, 0))           # per-channel affine
    blk_stat = pl.BlockSpec((1, C, 1), lambda b: (b, 0, 0))    # per-sample partials
    cparams = pltpu.CompilerParams(dimension_semantics=("parallel",))

    # Pass 1: 1x1 conv; emits raw h plus per-sample BN1 partial sums.
    h3, hsum, hsq = pl.pallas_call(
        _pointwise_stats_kernel,
        grid=grid,
        in_specs=[blk_act, pl.BlockSpec((C, C), lambda b: (0, 0))],
        out_specs=(blk_act, blk_stat, blk_stat),
        out_shape=(jax.ShapeDtypeStruct((B, C, S), jnp.float32),
                   jax.ShapeDtypeStruct((B, C, 1), jnp.float32),
                   jax.ShapeDtypeStruct((B, C, 1), jnp.float32)),
        compiler_params=cparams,
    )(x3, w1t)

    scale1, shift1 = _bn_affine(hsum, hsq, count, params["g1"], params["b1"])

    # Pass 2: BN1+ReLU fused in, channelwise 3x3x3 conv, BN2 partial sums out.
    z3, zsum, zsq = pl.pallas_call(
        functools.partial(_depthwise_stats_kernel, D=D, H=H, W=W, roll_fwd=roll_fwd),
        grid=grid,
        in_specs=[blk_act, blk_vec, blk_vec,
                  pl.BlockSpec((C, 27), lambda b: (0, 0)),
                  pl.BlockSpec((27, S), lambda b: (0, 0))],
        out_specs=(blk_act, blk_stat, blk_stat),
        out_shape=(jax.ShapeDtypeStruct((B, C, S), jnp.float32),
                   jax.ShapeDtypeStruct((B, C, 1), jnp.float32),
                   jax.ShapeDtypeStruct((B, C, 1), jnp.float32)),
        compiler_params=cparams,
    )(h3, scale1, shift1, wdwt, masks)

    scale2, shift2 = _bn_affine(zsum, zsq, count, params["g2"], params["b2"])

    # Pass 3: BN2 + ReLU + residual + ReLU.
    out3 = pl.pallas_call(
        _bn_residual_kernel,
        grid=grid,
        in_specs=[blk_act, blk_act, blk_vec, blk_vec],
        out_specs=blk_act,
        out_shape=jax.ShapeDtypeStruct((B, C, S), jnp.float32),
        compiler_params=cparams,
    )(z3, x3, scale2, shift2)

    return out3.reshape(B, C, D, H, W)


# ------------------------------------------------------------- pure-JAX ref ---

def _reference_forward(x, params):
    B, C, D, H, W = x.shape
    x5 = jnp.transpose(x, (0, 2, 3, 4, 1)).astype(jnp.float32)   # NDHWC
    x2 = x5.reshape(-1, C)

    # 1x1 conv; explicit f32 accumulation so the comparison tolerance can stay tight.
    h = jnp.zeros((x2.shape[0], C), jnp.float32)
    for ci in range(C):
        h = h + x2[:, ci:ci + 1] * params["w1"][ci][None, :]
    mu = h.mean(0, keepdims=True)
    var = ((h - mu) ** 2).mean(0, keepdims=True)
    h = jnp.maximum((h - mu) / jnp.sqrt(var + EPS) * params["g1"] + params["b1"], 0.0)

    h5 = h.reshape(B, D, H, W, C)
    hp = jnp.pad(h5, ((0, 0), (1, 1), (1, 1), (1, 1), (0, 0)))
    z = jnp.zeros_like(h5)
    k = 0
    for dz in range(3):
        for dy in range(3):
            for dx in range(3):
                z = z + hp[:, dz:dz + D, dy:dy + H, dx:dx + W, :] * params["wdw"][k]
                k += 1

    z2 = z.reshape(-1, C)
    mu2 = z2.mean(0, keepdims=True)
    var2 = ((z2 - mu2) ** 2).mean(0, keepdims=True)
    o = jnp.maximum((z2 - mu2) / jnp.sqrt(var2 + EPS) * params["g2"] + params["b2"], 0.0)
    o = jnp.maximum(o + x2, 0.0)
    return jnp.transpose(o.reshape(B, D, H, W, C), (0, 4, 1, 2, 3))


# --------------------------------------------------------------------- main ---

if __name__ == "__main__":
    key = jax.random.PRNGKey(0)
    kx, kp = jax.random.split(key)

    B, C, D, H, W = 2, 8, 8, 8, 8          # inplanes == planes == 8
    x = jax.random.normal(kx, (B, C, D, H, W), jnp.float32)
    params = init_params(kp, C)

    out = jax.block_until_ready(single_channel_conv_forward(x, params))
    ref = _reference_forward(x, params)

    assert out.shape == (B, C, D, H, W)
    assert bool(jnp.all(jnp.isfinite(out)))
    max_err = float(jnp.max(jnp.abs(out - ref)))
    assert bool(jnp.allclose(out, ref, rtol=1e-4, atol=1e-4)), (
        f"mismatch vs JAX reference, max abs err = {max_err}")

    print("KERNEL_OK")
</pallas_src>

<mosaic_0001>
module attributes {stable_mosaic.version = 11 : i64} {
  func.func @kernel(%arg0: memref<8x128xf32, #tpu.memory_space<vmem>>, %arg1: memref<8x128xf32, #tpu.memory_space<vmem>>) attributes {dimension_semantics = [], scalar_prefetch = 0 : i64, scratch_operands = 0 : i64, tpu.core_type = #tpu.core_type<tc>} {
    %c0 = arith.constant 0 : index
    %c0_0 = arith.constant 0 : index
    %0 = vector.load %arg0[%c0, %c0_0] : memref<8x128xf32, #tpu.memory_space<vmem>>, vector<8x128xf32>
    %c1_i32 = arith.constant 1 : i32
    %1 = tpu.dynamic_rotate %0 by %c1_i32 dim 1 : vector<8x128xf32>, i32 -> vector<8x128xf32>
    %c0_1 = arith.constant 0 : index
    %c0_2 = arith.constant 0 : index
    %2 = vector.load %arg1[%c0_1, %c0_2] : memref<8x128xf32, #tpu.memory_space<vmem>>, vector<8x128xf32>
    tpu.vector_store %arg1[%c0_1, %c0_2], %1 {strides = array<i32>} : memref<8x128xf32, #tpu.memory_space<vmem>>, vector<8x128xf32>,
    return
  }
}

</mosaic_0001>

<bundles_post_ra>
// kernel: tpu_custom_call.1
= control target key start
LH: loop header
LB: loop body
LE: loop exit
PB: predicated region body
PF: predicated region fallthrough
CT: control target
= control target key end

     0   :  { %6 = vsyncpa [#allocation3], 0  ;;  %s128_s0 = inlined_call_operand.hbm [shape: f32[8,128], index: 0, kind: input, shape index: {}]   ;;  %s129_s1 = inlined_call_operand.hbm [shape: f32[8,128], index: 1, kind: output, shape index: {}]  }
   0x1   :  { %7 = vsyncpa [#allocation4], 0  ;;  %s91_s6 = smov [#allocation2]   ;;  %s43_s10 = scalar_lea.hbm %s128_s0, 128 }
   0x2   :  { %s14_s7 = sshll.u32 %s91_s6, 4  ;;  %p44_p0 = scmp.ne.s32.totalorder %s128_s0, %s43_s10  ;;  %s15_s7 = int_to_ptr.vmem [resolvable:$true] %s14_s7 }
   0x3   :  { %p47_p1 = scmp.lt.u32.totalorder %s43_s10, %s128_s0 }
   0x5   :  { %p49_p2 = pnand %p47_p1, %p44_p0 }
   0x7   :  { %52 = shalt.err (!%p49_p2)
}
   0x8   :  { %s53_s15 = scalar_lea.vmem %s15_s7, 128  ;;  %p58_p4 = scmp.lt.s32.totalorder %s15_s7, %s15_s7 }
   0x9   :  { %p54_p3 = scmp.ne.s32.totalorder %s15_s7, %s53_s15  ;;  %p59_p5 = scmp.lt.s32.totalorder %s53_s15, %s53_s15 }
   0xb   :  { %p60_p6 = por %p59_p5, %p58_p4 }
   0xd   :  { %p61_p7 = pnand %p60_p6, %p54_p3 }
   0xf   :  { %64 = shalt.err (!%p61_p7)
}
  0x10   :  { %17 = dma.hbm_to_vmem [thread:$0]  %s128_s0, 128, %s15_s7, [#allocation3]  }
  0x11   :  { %87 = dma.done.wait [#allocation3], 128  }
  0x12   :  { %88 = vsyncadd [#allocation3], 4294967168  ;;  %v21_v0 = vld [vmem:[#allocation2] sm:$0xff]  ;;  %s92_s18 = smov 1   ;;  %s93_s19 = smov [#allocation5]  }
  0x13   :  { %22 = vrot.lane.b32.xlu0 %v21_v0, %s92_s18  ;;  %s31_s20 = sshll.u32 %s93_s19, 4  ;;  %s32_s20 = int_to_ptr.vmem [resolvable:$true] %s31_s20 }
  0x14   :  { %s65_s21 = scalar_lea.vmem %s32_s20, 128  ;;  %p70_p9 = scmp.lt.s32.totalorder %s32_s20, %s32_s20 }
  0x15   :  { %p66_p8 = scmp.ne.s32.totalorder %s32_s20, %s65_s21  ;;  %p71_p10 = scmp.lt.s32.totalorder %s65_s21, %s65_s21 }
  0x17   :  { %p72_p11 = por %p71_p10, %p70_p9 }
  0x19   :  { %p73_p12 = pnand %p72_p11, %p66_p8 }
  0x85   :  { %v23_v1 = vpop.permute.xlu0 %22 }
  0x86   :  { %24 = vst [vmem:[#allocation5] sm:$0xff] %v23_v1 }
  0x87   :  { %76 = shalt.err (!%p73_p12)
}
  0x88   :  { %s77_s0 = scalar_lea.hbm %s129_s1, 128 }
  0x89   :  { %p78_p13 = scmp.ne.s32.totalorder %s129_s1, %s77_s0  ;;  %p81_p0 = scmp.lt.u32.totalorder %s77_s0, %s129_s1 }
  0x8b   :  { %p83_p1 = pnand %p81_p0, %p78_p13 }
  0x8d   :  { %86 = shalt.err (!%p83_p1)
}
  0x8e   :  { %34 = dma.vmem_to_hbm [thread:$0]  %s32_s20, 128, %s129_s1, [#allocation4]  }
  0x8f   :  { %89 = dma.done.wait [#allocation4], 128  }
  0x90   :  { %90 = vsyncadd [#allocation4], 4294967168 }
  0x91   :  { %38 = vsyncpa [#allocation3], 1 }
  0x92   :  { %39 = vsyncpa [#allocation4], 1 }

</bundles_post_ra>
